<compile_context>
chip_gen: v7x
topology: tpu7x:2x2x1
jax: 0.10.0
libtpu: 0.0.40
codegen_flags: <defaults>
</compile_context>

<pallas_src>
import functools

import jax
import jax.numpy as jnp
from jax.experimental import pallas as pl
from jax.experimental.pallas import tpu as pltpu


def _round_up(x, m):
    return ((x + m - 1) // m) * m


def _rile_head_kernel(x_ref, w1_ref, b1_ref, w2_ref, b2_ref, o_ref):
    # Hidden layer on the MXU: [TB, D] @ [D, H] + [1, H] -> tanh (EUP).
    h = jnp.dot(x_ref[...], w1_ref[...], preferred_element_type=jnp.float32)
    h = jnp.tanh(h + b1_ref[...])
    # Output layer (H -> 1): VPU elementwise mul + XLU lane reduction instead
    # of a degenerate N=1 MXU matmul.  w2_ref is a (1, H) row.
    y = jnp.sum(h * w2_ref[...], axis=-1, keepdims=True) + b2_ref[...]
    o_ref[...] = jnp.tanh(y).astype(o_ref.dtype)


@functools.partial(jax.jit, static_argnames=("block_batch",))
def rile_regression_head(x, w1, b1, w2, b2, *, block_batch=512):
    """x: [B, input_dim]; w1: [D, H]; b1: [H]; w2: [H, 1]; b2: [1].

    Returns [B, 1] float32 = tanh(tanh(x @ w1 + b1) @ w2 + b2).
    """
    B, D = x.shape
    H = w1.shape[1]
    assert w1.shape == (D, H)
    assert w2.shape == (H, 1)

    # Batch tile: multiple of 8 (sublane), no larger than the (padded) batch.
    TB = min(_round_up(block_batch, 8), _round_up(B, 8))
    B_pad = _round_up(B, TB)
    if B_pad != B:
        x = jnp.pad(x, ((0, B_pad - B), (0, 0)))
    grid = (B_pad // TB,)

    b1_2d = b1.reshape(1, H).astype(jnp.float32)
    w2_row = w2.reshape(1, H).astype(jnp.float32)  # transposed: (1, H) row
    b2_2d = b2.reshape(1, 1).astype(jnp.float32)
    x = x.astype(jnp.float32)
    w1 = w1.astype(jnp.float32)

    # VMEM budget for the chosen tile (double-buffered x + resident weights
    # + hidden activations), with headroom; cap at 48 MiB to stay safe on
    # v7x's 64 MiB physical VMEM.
    tile_vmem_bytes = 4 * (2 * TB * D + 2 * D * H + 4 * H + 2 * TB + TB * H)
    vmem_limit = max(32 << 20, min(2 * tile_vmem_bytes, 48 << 20))

    cost = pl.CostEstimate(
        flops=2 * B_pad * D * H + 2 * B_pad * H,
        transcendentals=B_pad * (H + 1),
        bytes_accessed=4 * (B_pad * D + D * H + 2 * H + 1 + B_pad),
    )

    out = pl.pallas_call(
        _rile_head_kernel,
        out_shape=jax.ShapeDtypeStruct((B_pad, 1), jnp.float32),
        grid=grid,
        in_specs=[
            pl.BlockSpec((TB, D), lambda i: (i, 0)),   # x: tiled over batch
            pl.BlockSpec((D, H), lambda i: (0, 0)),    # W1: resident
            pl.BlockSpec((1, H), lambda i: (0, 0)),    # b1: resident
            pl.BlockSpec((1, H), lambda i: (0, 0)),    # w2 row: resident
            pl.BlockSpec((1, 1), lambda i: (0, 0)),    # b2: resident
        ],
        out_specs=pl.BlockSpec((TB, 1), lambda i: (i, 0)),
        compiler_params=pltpu.CompilerParams(
            dimension_semantics=("parallel",),
            vmem_limit_bytes=int(vmem_limit),
        ),
        cost_estimate=cost,
    )(x, w1, b1_2d, w2_row, b2_2d)

    return out[:B]


def _reference(x, w1, b1, w2, b2):
    h = jnp.tanh(x @ w1 + b1.reshape(1, -1))
    return jnp.tanh(h @ w2 + b2.reshape(1, 1))


if __name__ == "__main__":
    # Small shapes consistent with the module: input_dim=32, inner_dim=128
    # (stands in for the default 1024).
    INPUT_DIM, INNER_DIM = 32, 128

    key = jax.random.PRNGKey(0)
    kx, k1, k2, k3, k4, kx2 = jax.random.split(key, 6)

    # Deterministic synthetic parameters (small uniform init).
    w1 = jax.random.uniform(k1, (INPUT_DIM, INNER_DIM), jnp.float32, -0.1, 0.1)
    b1 = jax.random.uniform(k2, (INNER_DIM,), jnp.float32, -0.1, 0.1)
    w2 = jax.random.uniform(k3, (INNER_DIM, 1), jnp.float32, -0.1, 0.1)
    b2 = jax.random.uniform(k4, (1,), jnp.float32, -0.1, 0.1)

    # Case 1: small aligned batch, single tile.
    B1 = 8
    x1 = jax.random.normal(kx, (B1, INPUT_DIM), dtype=jnp.float32)
    out1 = jax.block_until_ready(rile_regression_head(x1, w1, b1, w2, b2))
    ref1 = _reference(x1, w1, b1, w2, b2)
    assert out1.shape == (B1, 1)
    assert jnp.allclose(out1, ref1, atol=1e-5, rtol=1e-5)

    # Case 2: batch not divisible by the tile -> exercises multi-tile grid,
    # padding, and the parallel batch axis.
    B2 = 20
    x2 = jax.random.normal(kx2, (B2, INPUT_DIM), dtype=jnp.float32)
    out2 = jax.block_until_ready(
        rile_regression_head(x2, w1, b1, w2, b2, block_batch=8)
    )
    ref2 = _reference(x2, w1, b1, w2, b2)
    assert out2.shape == (B2, 1)
    assert jnp.allclose(out2, ref2, atol=1e-5, rtol=1e-5)

    print("KERNEL_OK")
</pallas_src>

<mosaic_0001>
module attributes {stable_mosaic.version = 11 : i64} {
  func.func @_rile_head_kernel(%arg0: i32, %arg1: memref<8x32xf32, #tpu.memory_space<vmem>>, %arg2: memref<32x128xf32, #tpu.memory_space<vmem>>, %arg3: memref<1x128xf32, #tpu.memory_space<vmem>>, %arg4: memref<1x128xf32, #tpu.memory_space<vmem>>, %arg5: memref<1x1xf32, #tpu.memory_space<vmem>>, %arg6: memref<8x1xf32, #tpu.memory_space<vmem>>) attributes {dimension_semantics = [#tpu.dimension_semantics<parallel>], iteration_bounds = array<i64: 1>, scalar_prefetch = 0 : i64, scratch_operands = 0 : i64, tpu.core_type = #tpu.core_type<tc>, window_params = [{transform_indices = @transform_0, window_bounds = array<i64: 8, 32>}, {pipeline_mode = #tpu.pipeline_mode<synchronous>, transform_indices = @transform_1, window_bounds = array<i64: 32, 128>}, {pipeline_mode = #tpu.pipeline_mode<synchronous>, transform_indices = @transform_2, window_bounds = array<i64: 1, 128>}, {pipeline_mode = #tpu.pipeline_mode<synchronous>, transform_indices = @transform_3, window_bounds = array<i64: 1, 128>}, {pipeline_mode = #tpu.pipeline_mode<synchronous>, transform_indices = @transform_4, window_bounds = array<i64: 1, 1>}, {transform_indices = @transform_5, window_bounds = array<i64: 8, 1>}]} {
    %c0 = arith.constant 0 : index
    %c0_0 = arith.constant 0 : index
    %0 = vector.load %arg1[%c0, %c0_0] : memref<8x32xf32, #tpu.memory_space<vmem>>, vector<8x32xf32>
    %c0_1 = arith.constant 0 : index
    %c0_2 = arith.constant 0 : index
    %1 = vector.load %arg2[%c0_1, %c0_2] : memref<32x128xf32, #tpu.memory_space<vmem>>, vector<32x128xf32>
    %cst = arith.constant dense<0.000000e+00> : vector<8x128xf32>
    %2 = tpu.matmul %0, %1, %cst {dimension_numbers = #tpu.dot_dimension_numbers<[1], [0], [0], [1], [0, 0, 1, 1], [], []>} : vector<8x32xf32>, vector<32x128xf32>, vector<8x128xf32> -> vector<8x128xf32>
    %c0_3 = arith.constant 0 : index
    %c0_4 = arith.constant 0 : index
    %3 = vector.load %arg3[%c0_3, %c0_4] : memref<1x128xf32, #tpu.memory_space<vmem>>, vector<1x128xf32>
    %4 = vector.broadcast %3 : vector<1x128xf32> to vector<8x128xf32>
    %5 = arith.addf %2, %4 : vector<8x128xf32>
    %6 = math.tanh %5 : vector<8x128xf32>
    %c0_5 = arith.constant 0 : index
    %c0_6 = arith.constant 0 : index
    %7 = vector.load %arg4[%c0_5, %c0_6] : memref<1x128xf32, #tpu.memory_space<vmem>>, vector<1x128xf32>
    %8 = vector.broadcast %7 : vector<1x128xf32> to vector<8x128xf32>
    %9 = arith.mulf %6, %8 : vector<8x128xf32>
    %cst_7 = arith.constant dense<0.000000e+00> : vector<8xf32>
    %10 = vector.multi_reduction <add>, %9, %cst_7 [1] : vector<8x128xf32> to vector<8xf32>
    %11 = vector.shape_cast %10 : vector<8xf32> to vector<8x1xf32>
    %c0_8 = arith.constant 0 : index
    %c0_9 = arith.constant 0 : index
    %12 = vector.load %arg5[%c0_8, %c0_9] : memref<1x1xf32, #tpu.memory_space<vmem>>, vector<1x1xf32>
    %13 = vector.broadcast %12 : vector<1x1xf32> to vector<8x1xf32>
    %14 = arith.addf %11, %13 : vector<8x1xf32>
    %15 = math.tanh %14 : vector<8x1xf32>
    %c0_10 = arith.constant 0 : index
    %c0_11 = arith.constant 0 : index
    %16 = vector.load %arg6[%c0_10, %c0_11] : memref<8x1xf32, #tpu.memory_space<vmem>>, vector<8x1xf32>
    tpu.vector_store %arg6[%c0_10, %c0_11], %15 {strides = array<i32>} : memref<8x1xf32, #tpu.memory_space<vmem>>, vector<8x1xf32>,
    return
  }
  func.func @transform_0(%arg0: i32) -> (i32, i32) {
    %c0_i32 = arith.constant 0 : i32
    %c0_i32_0 = arith.constant 0 : i32
    return %arg0, %c0_i32 : i32, i32
  }
  func.func @transform_1(%arg0: i32) -> (i32, i32) {
    %c0_i32 = arith.constant 0 : i32
    %c0_i32_0 = arith.constant 0 : i32
    %c0_i32_1 = arith.constant 0 : i32
    return %c0_i32, %c0_i32_0 : i32, i32
  }
  func.func @transform_2(%arg0: i32) -> (i32, i32) {
    %c0_i32 = arith.constant 0 : i32
    %c0_i32_0 = arith.constant 0 : i32
    %c0_i32_1 = arith.constant 0 : i32
    return %c0_i32, %c0_i32_0 : i32, i32
  }
  func.func @transform_3(%arg0: i32) -> (i32, i32) {
    %c0_i32 = arith.constant 0 : i32
    %c0_i32_0 = arith.constant 0 : i32
    %c0_i32_1 = arith.constant 0 : i32
    return %c0_i32, %c0_i32_0 : i32, i32
  }
  func.func @transform_4(%arg0: i32) -> (i32, i32) {
    %c0_i32 = arith.constant 0 : i32
    %c0_i32_0 = arith.constant 0 : i32
    %c0_i32_1 = arith.constant 0 : i32
    return %c0_i32, %c0_i32_0 : i32, i32
  }
  func.func @transform_5(%arg0: i32) -> (i32, i32) {
    %c0_i32 = arith.constant 0 : i32
    %c0_i32_0 = arith.constant 0 : i32
    return %arg0, %c0_i32 : i32, i32
  }
}

</mosaic_0001>

<bundles_post_ra>
// kernel: rile_regression_head.1
= control target key start
LH: loop header
LB: loop body
LE: loop exit
PB: predicated region body
PF: predicated region fallthrough
CT: control target
= control target key end

     0   :  { %s272_s0 = inlined_call_operand.vmem [shape: f32[8,32], index: 0, kind: input, shape index: {}]   ;;  %s273_s1 = inlined_call_operand.hbm [shape: f32[32,128], index: 1, kind: input, shape index: {}]   ;;  %s274_s2 = inlined_call_operand.vmem [shape: f32[1,128], index: 2, kind: input, shape index: {}]   ;;  %s275_s3 = inlined_call_operand.vmem [shape: f32[1,128], index: 3, kind: input, shape index: {}]   ;;  %s276_s4 = inlined_call_operand.<no memory space> [shape: f32[1,1], index: 4, kind: input, shape index: {}]   ;;  %s277_s5 = inlined_call_operand.vmem [shape: f32[8,1], index: 5, kind: output, shape index: {}]  }
   0x1   :  { %v10_v0 = vstv %s276_s4 }
   0x2   :  { %11 = vst [vmem:[#allocation2] sm:$0x1] %v10_v0 }
   0x3   :  { %12 = vsyncpa [#allocation4], 0  ;;  %s209_s20 = smov [#allocation3]   ;;  %s185_s24 = scalar_lea.hbm %s273_s1, 512 }
   0x4   :  { %s20_s21 = sshll.u32 %s209_s20, 4  ;;  %p186_p0 = scmp.ne.s32.totalorder %s273_s1, %s185_s24  ;;  %s21_s21 = int_to_ptr.vmem [resolvable:$true] %s20_s21 }
   0x5   :  { %p189_p1 = scmp.lt.u32.totalorder %s185_s24, %s273_s1 }
   0x7   :  { %p191_p2 = pnand %p189_p1, %p186_p0 }
   0x9   :  { %194 = shalt.err (!%p191_p2)
}
   0xa   :  { %s195_s4 = scalar_lea.vmem %s21_s21, 512  ;;  %p200_p4 = scmp.lt.s32.totalorder %s21_s21, %s21_s21 }
   0xb   :  { %p196_p3 = scmp.ne.s32.totalorder %s21_s21, %s195_s4  ;;  %p201_p5 = scmp.lt.s32.totalorder %s195_s4, %s195_s4 }
   0xd   :  { %p202_p6 = por %p201_p5, %p200_p4 }
   0xf   :  { %p203_p7 = pnand %p202_p6, %p196_p3 }
  0x11   :  { %206 = shalt.err (!%p203_p7)
}
  0x12   :  { %s210_s29 = smov 128   ;;  %s211_s30 = smov 8  }
  0x13   :  { %26 = dma.hbm_to_vmem [thread:$0]  %s273_s1, 512, %s21_s21, [#allocation4], %s210_s29, %s210_s29, %s211_s30  }
  0x14   :  { %207 = dma.done.wait [#allocation4], 512  }
  0x15   :  { %208 = vsyncadd [#allocation4], 4294966784  ;;  %v212_v1 = vmov 0.0|0.0   ;;  %vm213_vm0 = vmmov 0   ;;  %v214_v2 = vmov 0.0   ;;  %v37_v3 = vld [vmem:[#allocation3] sm:$0xff] }
  0x16   :  { %169 = vmatprep.subr.bf16.mxu0 %v212_v1  ;;  %166 = vmatprep.mubr.msk.f32.mxu0 %vm213_vm0, %v214_v2  ;;  %v38_v4 = vld [vmem:[#allocation3 + $0x8] sm:$0xff]  ;;  %v39_v5 = vld [vmem:[#allocation3 + $0x10] sm:$0xff]  ;;  %v40_v7 = vld [vmem:[#allocation3 + $0x18] sm:$0xff]  ;;  %vm48_vm1 = vcmask 261120   ;;  %vm142_vm2 = vcmask 7168  }
  0x17   :  { %v170_v6 = vpack.c.bf16 %v38_v4, %v37_v3  ;;  %v173_v8 = vpack.c.bf16 %v40_v7, %v39_v5  ;;  %v36_v9 = vld [vmem:[%s272_s0] sm:$0xff] }
  0x18   :  { %v149_v10 = vld [vmem:[%s274_s2] ss:$0 sm:$0xff] }
  0x19   :  { %171 = vmatpush3.bf16.msra.mxu0 %v170_v6  ;;  %v151_v14 = vld [vmem:[%s275_s3] ss:$0 sm:$0xff] }
  0x1a   :  { %172 = vmatprep.subr.bf16.mxu0 %v212_v1  ;;  %v152_v17 = vld [vmem:[#allocation2] ss:$0 sm:$0xff] }
  0x1d   :  { %174 = vmatpush3.bf16.msra.mxu0 %v173_v8 }
  0x20   :  { %167 = vmatmul.mubr.msk.f32.vlgmr.msra.gmra.mrb[0].mxu0 %vm48_vm1, %v36_v9 }
  0xf3   :  { %v118_v11 = vpop.f32.mrb[0].mxu0 }
  0xf4   :  { %v119_v12 = vadd.f32 %v149_v10, %v118_v11  ;;  %v168_v13 = vpop.f32.mrb[1].mxu0 }
  0xf6   :  { %181 = vtanh.f32 %v119_v12 }
 0x100   :  { %v182_v15 = vpop.eup %181 }
 0x101   :  { %v130_v16 = vmul.f32 %v182_v15, %v151_v14 }
 0x103   :  { %131 = vadd.xlane.f32.xlu0 %v130_v16 }
 0x190   :  { %v132_v18 = vpop.xlane.xlu0 %131 }
 0x191   :  { %v140_v19 = vadd.f32 %v152_v17, %v132_v18 }
 0x193   :  { %183 = vtanh.f32 %v140_v19 }
 0x19d   :  { %v184_v20 = vpop.eup %183 }
 0x19e   :  { %143 = vst.msk [vmem:[%s277_s5] sm:$0xff] %vm142_vm2, %v184_v20 }
 0x19f   :  { %148 = vsyncpa [#allocation4], 1 }

</bundles_post_ra>
